<compile_context>
chip_gen: v7x
topology: tpu7x:2x2x1
jax: 0.10.0
libtpu: 0.0.40
codegen_flags: <defaults>
</compile_context>

<pallas_src>
import jax
import jax.numpy as jnp
from jax.experimental import pallas as pl
from jax.experimental.pallas import tpu as pltpu


def _pa_kernel_small_c(x_ref, w_ref, b_ref, o_ref):
    """VPU path for tiny channel counts (no MXU).

    x_ref: VMEM (1, C, TP) pixel tile (channels in sublanes, pixels in lanes)
    w_ref: SMEM (C, C)     1x1 conv weight, [out_ch, in_ch]
    b_ref: SMEM (C,)       bias
    o_ref: VMEM (1, C, TP)
    """
    x = x_ref[0].astype(jnp.float32)              # (C, TP)
    C, TP = x.shape
    rows = []
    for co in range(C):                           # fully unrolled: C*C VPU FMAs
        y = jnp.zeros((1, TP), jnp.float32) + b_ref[co]
        for ci in range(C):
            y = y + w_ref[co, ci] * x[ci:ci + 1, :]
        rows.append(x[co:co + 1, :] * jax.nn.sigmoid(y))   # sigmoid -> EUP
    o_ref[0] = jnp.concatenate(rows, axis=0).astype(o_ref.dtype)


def _pa_kernel_mxu(x_ref, w_ref, b_ref, o_ref):
    """MXU path for larger channel counts.

    x_ref: VMEM (1, C, TP);  w_ref: VMEM (C, C) [out_ch, in_ch];  b_ref: VMEM (C, 1)
    """
    x = x_ref[0].astype(jnp.float32)              # (C, TP)
    w = w_ref[...].astype(jnp.float32)            # contraction over in_ch: no .T needed
    b = b_ref[...].astype(jnp.float32)            # (C, 1)
    y = jnp.dot(w, x, preferred_element_type=jnp.float32) + b
    o_ref[0] = (x * jax.nn.sigmoid(y)).astype(o_ref.dtype)


def _choose_pixel_tile(hw, requested):
    if hw % 128 != 0:
        return hw                       # full extent: always a legal block size
    t = max(128, min(requested, hw))
    return (t // 128) * 128             # lane-aligned tile


def pa_forward(x_nchw, weight, bias, *, tile_p=2048):
    """Pixel attention forward.

    x_nchw: (N, C, H, W)
    weight: (C, C)  1x1 conv weight squeezed from (C, C, 1, 1), [out_ch, in_ch]
    bias:   (C,)
    """
    N, C, H, W = x_nchw.shape

    # submodel = Identity (PA wraps an arbitrary submodel).
    # TODO(synk): feed a real submodel output here if PA wraps a non-identity submodel.
    conv_x = x_nchw

    HW = H * W
    x3 = conv_x.reshape(N, C, HW)       # free reshape, no transpose, no padding
    tp = _choose_pixel_tile(HW, tile_p)
    grid = (N, pl.cdiv(HW, tp))         # ragged last block handled by Pallas masking

    small_c = C <= 8
    if small_c:
        kernel = _pa_kernel_small_c
        w_arg, b_arg = weight, bias
        w_spec = pl.BlockSpec(memory_space=pltpu.MemorySpace.SMEM)
        b_spec = pl.BlockSpec(memory_space=pltpu.MemorySpace.SMEM)
    else:
        kernel = _pa_kernel_mxu
        w_arg, b_arg = weight, bias.reshape(C, 1)
        w_spec = pl.BlockSpec((C, C), lambda n, p: (0, 0))
        b_spec = pl.BlockSpec((C, 1), lambda n, p: (0, 0))

    # Raise the scoped VMEM limit only when the double-buffered tiles actually
    # need it (v5e default scoped limit is 16 MiB; stay well under v7x's 64 MiB).
    itemsize = jnp.dtype(x_nchw.dtype).itemsize
    est_vmem = 4 * C * tp * itemsize + (0 if small_c else 2 * C * (C + 1) * 4)
    vmem_limit = None
    if est_vmem > 16 * 1024 * 1024:
        vmem_limit = min(2 * est_vmem, 48 * 1024 * 1024)

    out3 = pl.pallas_call(
        kernel,
        out_shape=jax.ShapeDtypeStruct((N, C, HW), x_nchw.dtype),
        grid_spec=pltpu.PrefetchScalarGridSpec(
            num_scalar_prefetch=0,
            grid=grid,
            in_specs=[
                pl.BlockSpec((1, C, tp), lambda n, p: (n, 0, p)),   # pixel tile
                w_spec,                                             # weight (grid-invariant)
                b_spec,                                             # bias   (grid-invariant)
            ],
            out_specs=pl.BlockSpec((1, C, tp), lambda n, p: (n, 0, p)),
        ),
        compiler_params=pltpu.CompilerParams(
            dimension_semantics=("parallel", "parallel"),
            vmem_limit_bytes=vmem_limit,
        ),
    )(x3, w_arg, b_arg)

    return out3.reshape(N, C, H, W)     # free reshape back to NCHW


def pa_reference(x_nchw, weight, bias):
    """Pure-JAX reference for correctness checking."""
    conv_x = x_nchw  # submodel = Identity
    y = jnp.einsum("nchw,oc->nohw", conv_x, weight) + bias[None, :, None, None]
    return conv_x * jax.nn.sigmoid(y)


if __name__ == "__main__":
    key = jax.random.PRNGKey(0)
    k_x, k_w, k_b = jax.random.split(key, 3)

    N, C, H, W = 2, 4, 16, 16
    x = jax.random.normal(k_x, (N, C, H, W), dtype=jnp.float32)

    # Deterministic Conv2d(C, C, 1) params (PyTorch-style uniform +-1/sqrt(fan_in)).
    bound = 1.0 / (C ** 0.5)
    weight = jax.random.uniform(k_w, (C, C), jnp.float32, -bound, bound)
    bias = jax.random.uniform(k_b, (C,), jnp.float32, -bound, bound)

    out = jax.block_until_ready(pa_forward(x, weight, bias))
    ref = pa_reference(x, weight, bias)

    assert out.shape == (N, C, H, W)
    assert jnp.allclose(out, ref, atol=1e-5, rtol=1e-5), "mismatch vs reference"

    print("KERNEL_OK")
</pallas_src>

<mosaic_0001>
module attributes {stable_mosaic.version = 11 : i64} {
  func.func @_pa_kernel_small_c(%arg0: i32, %arg1: i32, %arg2: memref<1x4x256xf32, #tpu.memory_space<vmem>>, %arg3: memref<4x4xf32, #tpu.memory_space<smem>>, %arg4: memref<4xf32, #tpu.memory_space<smem>>, %arg5: memref<1x4x256xf32, #tpu.memory_space<vmem>>) attributes {dimension_semantics = [#tpu.dimension_semantics<parallel>, #tpu.dimension_semantics<parallel>], iteration_bounds = array<i64: 2, 1>, scalar_prefetch = 0 : i64, scratch_operands = 0 : i64, tpu.core_type = #tpu.core_type<tc>, window_params = [{transform_indices = @transform_0, window_bounds = array<i64: 1, 4, 256>}, {transform_indices = @transform_1, window_bounds = array<i64: 4, 4>}, {transform_indices = @transform_2, window_bounds = array<i64: 4>}, {transform_indices = @transform_3, window_bounds = array<i64: 1, 4, 256>}]} {
    %c0 = arith.constant 0 : index
    %c0_0 = arith.constant 0 : index
    %c0_1 = arith.constant 0 : index
    %0 = vector.load %arg2[%c0, %c0_0, %c0_1] : memref<1x4x256xf32, #tpu.memory_space<vmem>>, vector<1x4x256xf32>
    %1 = vector.shape_cast %0 : vector<1x4x256xf32> to vector<4x256xf32>
    %cst = arith.constant 0.000000e+00 : f32
    %2 = vector.broadcast %cst : f32 to vector<1x256xf32>
    %c0_2 = arith.constant 0 : index
    %3 = memref.load %arg4[%c0_2] : memref<4xf32, #tpu.memory_space<smem>>
    %4 = vector.broadcast %3 : f32 to vector<1x256xf32>
    %5 = arith.addf %2, %4 : vector<1x256xf32>
    %c0_3 = arith.constant 0 : index
    %c0_4 = arith.constant 0 : index
    %6 = memref.load %arg3[%c0_3, %c0_4] : memref<4x4xf32, #tpu.memory_space<smem>>
    %7 = vector.extract_strided_slice %1 {offsets = [0, 0], sizes = [1, 256], strides = [1, 1]} : vector<4x256xf32> to vector<1x256xf32>
    %8 = vector.broadcast %6 : f32 to vector<1x256xf32>
    %9 = arith.mulf %8, %7 : vector<1x256xf32>
    %10 = arith.addf %5, %9 : vector<1x256xf32>
    %c0_5 = arith.constant 0 : index
    %c1 = arith.constant 1 : index
    %11 = memref.load %arg3[%c0_5, %c1] : memref<4x4xf32, #tpu.memory_space<smem>>
    %12 = vector.extract_strided_slice %1 {offsets = [1, 0], sizes = [1, 256], strides = [1, 1]} : vector<4x256xf32> to vector<1x256xf32>
    %13 = vector.broadcast %11 : f32 to vector<1x256xf32>
    %14 = arith.mulf %13, %12 : vector<1x256xf32>
    %15 = arith.addf %10, %14 : vector<1x256xf32>
    %c0_6 = arith.constant 0 : index
    %c2 = arith.constant 2 : index
    %16 = memref.load %arg3[%c0_6, %c2] : memref<4x4xf32, #tpu.memory_space<smem>>
    %17 = vector.extract_strided_slice %1 {offsets = [2, 0], sizes = [1, 256], strides = [1, 1]} : vector<4x256xf32> to vector<1x256xf32>
    %18 = vector.broadcast %16 : f32 to vector<1x256xf32>
    %19 = arith.mulf %18, %17 : vector<1x256xf32>
    %20 = arith.addf %15, %19 : vector<1x256xf32>
    %c0_7 = arith.constant 0 : index
    %c3 = arith.constant 3 : index
    %21 = memref.load %arg3[%c0_7, %c3] : memref<4x4xf32, #tpu.memory_space<smem>>
    %22 = vector.extract_strided_slice %1 {offsets = [3, 0], sizes = [1, 256], strides = [1, 1]} : vector<4x256xf32> to vector<1x256xf32>
    %23 = vector.broadcast %21 : f32 to vector<1x256xf32>
    %24 = arith.mulf %23, %22 : vector<1x256xf32>
    %25 = arith.addf %20, %24 : vector<1x256xf32>
    %26 = vector.extract_strided_slice %1 {offsets = [0, 0], sizes = [1, 256], strides = [1, 1]} : vector<4x256xf32> to vector<1x256xf32>
    %27 = arith.negf %25 : vector<1x256xf32>
    %28 = math.exp %27 : vector<1x256xf32>
    %cst_8 = arith.constant 1.000000e+00 : f32
    %29 = vector.broadcast %cst_8 : f32 to vector<1x256xf32>
    %30 = arith.addf %29, %28 : vector<1x256xf32>
    %31 = arith.divf %29, %30 : vector<1x256xf32>
    %32 = arith.mulf %26, %31 : vector<1x256xf32>
    %cst_9 = arith.constant 0.000000e+00 : f32
    %33 = vector.broadcast %cst_9 : f32 to vector<1x256xf32>
    %c1_10 = arith.constant 1 : index
    %34 = memref.load %arg4[%c1_10] : memref<4xf32, #tpu.memory_space<smem>>
    %35 = vector.broadcast %34 : f32 to vector<1x256xf32>
    %36 = arith.addf %33, %35 : vector<1x256xf32>
    %c1_11 = arith.constant 1 : index
    %c0_12 = arith.constant 0 : index
    %37 = memref.load %arg3[%c1_11, %c0_12] : memref<4x4xf32, #tpu.memory_space<smem>>
    %38 = vector.extract_strided_slice %1 {offsets = [0, 0], sizes = [1, 256], strides = [1, 1]} : vector<4x256xf32> to vector<1x256xf32>
    %39 = vector.broadcast %37 : f32 to vector<1x256xf32>
    %40 = arith.mulf %39, %38 : vector<1x256xf32>
    %41 = arith.addf %36, %40 : vector<1x256xf32>
    %c1_13 = arith.constant 1 : index
    %c1_14 = arith.constant 1 : index
    %42 = memref.load %arg3[%c1_13, %c1_14] : memref<4x4xf32, #tpu.memory_space<smem>>
    %43 = vector.extract_strided_slice %1 {offsets = [1, 0], sizes = [1, 256], strides = [1, 1]} : vector<4x256xf32> to vector<1x256xf32>
    %44 = vector.broadcast %42 : f32 to vector<1x256xf32>
    %45 = arith.mulf %44, %43 : vector<1x256xf32>
    %46 = arith.addf %41, %45 : vector<1x256xf32>
    %c1_15 = arith.constant 1 : index
    %c2_16 = arith.constant 2 : index
    %47 = memref.load %arg3[%c1_15, %c2_16] : memref<4x4xf32, #tpu.memory_space<smem>>
    %48 = vector.extract_strided_slice %1 {offsets = [2, 0], sizes = [1, 256], strides = [1, 1]} : vector<4x256xf32> to vector<1x256xf32>
    %49 = vector.broadcast %47 : f32 to vector<1x256xf32>
    %50 = arith.mulf %49, %48 : vector<1x256xf32>
    %51 = arith.addf %46, %50 : vector<1x256xf32>
    %c1_17 = arith.constant 1 : index
    %c3_18 = arith.constant 3 : index
    %52 = memref.load %arg3[%c1_17, %c3_18] : memref<4x4xf32, #tpu.memory_space<smem>>
    %53 = vector.extract_strided_slice %1 {offsets = [3, 0], sizes = [1, 256], strides = [1, 1]} : vector<4x256xf32> to vector<1x256xf32>
    %54 = vector.broadcast %52 : f32 to vector<1x256xf32>
    %55 = arith.mulf %54, %53 : vector<1x256xf32>
    %56 = arith.addf %51, %55 : vector<1x256xf32>
    %57 = vector.extract_strided_slice %1 {offsets = [1, 0], sizes = [1, 256], strides = [1, 1]} : vector<4x256xf32> to vector<1x256xf32>
    %58 = arith.negf %56 : vector<1x256xf32>
    %59 = math.exp %58 : vector<1x256xf32>
    %cst_19 = arith.constant 1.000000e+00 : f32
    %60 = vector.broadcast %cst_19 : f32 to vector<1x256xf32>
    %61 = arith.addf %60, %59 : vector<1x256xf32>
    %62 = arith.divf %60, %61 : vector<1x256xf32>
    %63 = arith.mulf %57, %62 : vector<1x256xf32>
    %cst_20 = arith.constant 0.000000e+00 : f32
    %64 = vector.broadcast %cst_20 : f32 to vector<1x256xf32>
    %c2_21 = arith.constant 2 : index
    %65 = memref.load %arg4[%c2_21] : memref<4xf32, #tpu.memory_space<smem>>
    %66 = vector.broadcast %65 : f32 to vector<1x256xf32>
    %67 = arith.addf %64, %66 : vector<1x256xf32>
    %c2_22 = arith.constant 2 : index
    %c0_23 = arith.constant 0 : index
    %68 = memref.load %arg3[%c2_22, %c0_23] : memref<4x4xf32, #tpu.memory_space<smem>>
    %69 = vector.extract_strided_slice %1 {offsets = [0, 0], sizes = [1, 256], strides = [1, 1]} : vector<4x256xf32> to vector<1x256xf32>
    %70 = vector.broadcast %68 : f32 to vector<1x256xf32>
    %71 = arith.mulf %70, %69 : vector<1x256xf32>
    %72 = arith.addf %67, %71 : vector<1x256xf32>
    %c2_24 = arith.constant 2 : index
    %c1_25 = arith.constant 1 : index
    %73 = memref.load %arg3[%c2_24, %c1_25] : memref<4x4xf32, #tpu.memory_space<smem>>
    %74 = vector.extract_strided_slice %1 {offsets = [1, 0], sizes = [1, 256], strides = [1, 1]} : vector<4x256xf32> to vector<1x256xf32>
    %75 = vector.broadcast %73 : f32 to vector<1x256xf32>
    %76 = arith.mulf %75, %74 : vector<1x256xf32>
    %77 = arith.addf %72, %76 : vector<1x256xf32>
    %c2_26 = arith.constant 2 : index
    %c2_27 = arith.constant 2 : index
    %78 = memref.load %arg3[%c2_26, %c2_27] : memref<4x4xf32, #tpu.memory_space<smem>>
    %79 = vector.extract_strided_slice %1 {offsets = [2, 0], sizes = [1, 256], strides = [1, 1]} : vector<4x256xf32> to vector<1x256xf32>
    %80 = vector.broadcast %78 : f32 to vector<1x256xf32>
    %81 = arith.mulf %80, %79 : vector<1x256xf32>
    %82 = arith.addf %77, %81 : vector<1x256xf32>
    %c2_28 = arith.constant 2 : index
    %c3_29 = arith.constant 3 : index
    %83 = memref.load %arg3[%c2_28, %c3_29] : memref<4x4xf32, #tpu.memory_space<smem>>
    %84 = vector.extract_strided_slice %1 {offsets = [3, 0], sizes = [1, 256], strides = [1, 1]} : vector<4x256xf32> to vector<1x256xf32>
    %85 = vector.broadcast %83 : f32 to vector<1x256xf32>
    %86 = arith.mulf %85, %84 : vector<1x256xf32>
    %87 = arith.addf %82, %86 : vector<1x256xf32>
    %88 = vector.extract_strided_slice %1 {offsets = [2, 0], sizes = [1, 256], strides = [1, 1]} : vector<4x256xf32> to vector<1x256xf32>
    %89 = arith.negf %87 : vector<1x256xf32>
    %90 = math.exp %89 : vector<1x256xf32>
    %cst_30 = arith.constant 1.000000e+00 : f32
    %91 = vector.broadcast %cst_30 : f32 to vector<1x256xf32>
    %92 = arith.addf %91, %90 : vector<1x256xf32>
    %93 = arith.divf %91, %92 : vector<1x256xf32>
    %94 = arith.mulf %88, %93 : vector<1x256xf32>
    %cst_31 = arith.constant 0.000000e+00 : f32
    %95 = vector.broadcast %cst_31 : f32 to vector<1x256xf32>
    %c3_32 = arith.constant 3 : index
    %96 = memref.load %arg4[%c3_32] : memref<4xf32, #tpu.memory_space<smem>>
    %97 = vector.broadcast %96 : f32 to vector<1x256xf32>
    %98 = arith.addf %95, %97 : vector<1x256xf32>
    %c3_33 = arith.constant 3 : index
    %c0_34 = arith.constant 0 : index
    %99 = memref.load %arg3[%c3_33, %c0_34] : memref<4x4xf32, #tpu.memory_space<smem>>
    %100 = vector.extract_strided_slice %1 {offsets = [0, 0], sizes = [1, 256], strides = [1, 1]} : vector<4x256xf32> to vector<1x256xf32>
    %101 = vector.broadcast %99 : f32 to vector<1x256xf32>
    %102 = arith.mulf %101, %100 : vector<1x256xf32>
    %103 = arith.addf %98, %102 : vector<1x256xf32>
    %c3_35 = arith.constant 3 : index
    %c1_36 = arith.constant 1 : index
    %104 = memref.load %arg3[%c3_35, %c1_36] : memref<4x4xf32, #tpu.memory_space<smem>>
    %105 = vector.extract_strided_slice %1 {offsets = [1, 0], sizes = [1, 256], strides = [1, 1]} : vector<4x256xf32> to vector<1x256xf32>
    %106 = vector.broadcast %104 : f32 to vector<1x256xf32>
    %107 = arith.mulf %106, %105 : vector<1x256xf32>
    %108 = arith.addf %103, %107 : vector<1x256xf32>
    %c3_37 = arith.constant 3 : index
    %c2_38 = arith.constant 2 : index
    %109 = memref.load %arg3[%c3_37, %c2_38] : memref<4x4xf32, #tpu.memory_space<smem>>
    %110 = vector.extract_strided_slice %1 {offsets = [2, 0], sizes = [1, 256], strides = [1, 1]} : vector<4x256xf32> to vector<1x256xf32>
    %111 = vector.broadcast %109 : f32 to vector<1x256xf32>
    %112 = arith.mulf %111, %110 : vector<1x256xf32>
    %113 = arith.addf %108, %112 : vector<1x256xf32>
    %c3_39 = arith.constant 3 : index
    %c3_40 = arith.constant 3 : index
    %114 = memref.load %arg3[%c3_39, %c3_40] : memref<4x4xf32, #tpu.memory_space<smem>>
    %115 = vector.extract_strided_slice %1 {offsets = [3, 0], sizes = [1, 256], strides = [1, 1]} : vector<4x256xf32> to vector<1x256xf32>
    %116 = vector.broadcast %114 : f32 to vector<1x256xf32>
    %117 = arith.mulf %116, %115 : vector<1x256xf32>
    %118 = arith.addf %113, %117 : vector<1x256xf32>
    %119 = vector.extract_strided_slice %1 {offsets = [3, 0], sizes = [1, 256], strides = [1, 1]} : vector<4x256xf32> to vector<1x256xf32>
    %120 = arith.negf %118 : vector<1x256xf32>
    %121 = math.exp %120 : vector<1x256xf32>
    %cst_41 = arith.constant 1.000000e+00 : f32
    %122 = vector.broadcast %cst_41 : f32 to vector<1x256xf32>
    %123 = arith.addf %122, %121 : vector<1x256xf32>
    %124 = arith.divf %122, %123 : vector<1x256xf32>
    %125 = arith.mulf %119, %124 : vector<1x256xf32>
    %126 = tpu.concatenate %32, %63, %94, %125 in 0 : vector<1x256xf32>, vector<1x256xf32>, vector<1x256xf32>, vector<1x256xf32> -> vector<4x256xf32>
    %c0_42 = arith.constant 0 : index
    %c0_43 = arith.constant 0 : index
    %c0_44 = arith.constant 0 : index
    %127 = vector.load %arg5[%c0_42, %c0_43, %c0_44] : memref<1x4x256xf32, #tpu.memory_space<vmem>>, vector<1x4x256xf32>
    %128 = vector.shape_cast %127 : vector<1x4x256xf32> to vector<4x256xf32>
    %129 = vector.shape_cast %126 : vector<4x256xf32> to vector<1x4x256xf32>
    tpu.vector_store %arg5[%c0_42, %c0_43, %c0_44], %129 {strides = array<i32>} : memref<1x4x256xf32, #tpu.memory_space<vmem>>, vector<1x4x256xf32>,
    return
  }
  func.func @transform_0(%arg0: i32, %arg1: i32) -> (i32, i32, i32) {
    %c0_i32 = arith.constant 0 : i32
    %c0_i32_0 = arith.constant 0 : i32
    return %arg0, %c0_i32, %arg1 : i32, i32, i32
  }
  func.func @transform_1(%arg0: i32, %arg1: i32) -> (i32, i32) {
    %c0_i32 = arith.constant 0 : i32
    %c0_i32_0 = arith.constant 0 : i32
    %c0_i32_1 = arith.constant 0 : i32
    return %c0_i32, %c0_i32_0 : i32, i32
  }
  func.func @transform_2(%arg0: i32, %arg1: i32) -> i32 {
    %c0_i32 = arith.constant 0 : i32
    %c0_i32_0 = arith.constant 0 : i32
    return %c0_i32 : i32
  }
  func.func @transform_3(%arg0: i32, %arg1: i32) -> (i32, i32, i32) {
    %c0_i32 = arith.constant 0 : i32
    %c0_i32_0 = arith.constant 0 : i32
    return %arg0, %c0_i32, %arg1 : i32, i32, i32
  }
}

</mosaic_0001>

<bundles_post_ra>
// kernel: tpu_custom_call.1
= control target key start
LH: loop header
LB: loop body
LE: loop exit
PB: predicated region body
PF: predicated region fallthrough
CT: control target
= control target key end

     0   :  { %8 = vsyncpa [#allocation3], 0  ;;  %s1193_s0 = inlined_call_operand.hbm [shape: f32[2,4,256], index: 0, kind: input, shape index: {}]   ;;  %s1194_s1 = inlined_call_operand.hbm [shape: f32[4,4], index: 1, kind: input, shape index: {}]   ;;  %s1195_s2 = inlined_call_operand.vmem [shape: f32[4], index: 2, kind: input, shape index: {}]   ;;  %s1196_s3 = inlined_call_operand.hbm [shape: f32[2,4,256], index: 3, kind: output, shape index: {}]  }
   0x1   :  { %10 = vsyncpa [#allocation3 + $0x1], 0 }
   0x2   :  { %11 = vsyncpa [#allocation5], 0 }
   0x3   :  { %12 = vsyncpa [#allocation6], 0 }
   0x4   :  { %13 = vsyncpa [#allocation4], 0 }
   0x5   :  { %15 = vsyncpa [#allocation4 + $0x1], 0  ;;  %s905_s12 = smov 0   ;;  %s907_s13 = smov 0  }
   0x6   :  { %s909_s14 = smov 0   ;;  %s911_s15 = smov 0  }
   0x7   :  { %s913_s16 = smov 0   ;;  %s915_s17 = smov 0  }
   0x8 LB: > { %s577_s18 = sadd.s32 4294967295, %s879_s17   ;;  %s578_s19 = sadd.s32 4294967294, %s879_s17   ;;  %s879_s17 = sphi %s915_s17, %s21_s17   ;;  %s875_s16 = sphi %s913_s16, %s1221_s16   ;;  %s871_s15 = sphi %s911_s15, %s1220_s15   ;;  %s867_s14 = sphi %s909_s14, %s1219_s14   ;;  %s863_s13 = sphi %s907_s13, %s1218_s13   ;;  %s859_s12 = sphi %s905_s12, %s1217_s12  }
   0x9   : > { %p55_p0 = scmp.ne.s32.totalorder %s863_s13, %s859_s12  ;;  %p939_p1 = scmp.eq.s32.totalorder %s577_s18, 0 }
   0xa   : > { %p943_p2 = scmp.eq.s32.totalorder %s577_s18, 1  ;;  %p129_p3 = scmp.eq.s32.totalorder %s578_s19, 1 }
   0xb   : > { %s1202_s20 = scalar_select %p939_p1, 1, 0 }
   0xc   : > { %p949_p4 = por %p939_p1, %p55_p0  ;;  %p579_p5 = scmp.ge.s32.totalorder %s879_s17, 1 }
   0xd   : > { %p954_p6 = por %p129_p3, %p55_p0  ;;  %p136_p7 = scmp.lt.s32.totalorder %s879_s17, 3 }
   0xe   : > { %s1204_s22 = scalar_select %p949_p4, 1, 0 }
   0xf   : > { %s1205_s23 = scalar_select %p954_p6, 1, 0 }
  0x10   : > { %p959_p8 = pnand %p579_p5, %p136_p7  ;;  %s158_s27 = sshll.u32 %s1195_s2, 4  ;;  %s159_s27 = int_to_ptr.vmem [resolvable:$true] %s158_s27 }
  0x11   : > { %s33_s29 = sadd.s32 1, %s875_s16  ;;  %s731_s6 = scalar_lea.hbm %s1194_s1, 64 }
  0x12   : > { %s1206_s24 = scalar_select %p959_p8, 1, 0 }
  0x13   : > { %p644_p10 = pneg %p959_p8  ;;  %p976_p12 = scmp.ge.s32.totalorder %s33_s29, 2 }
  0x14   : > { %p732_p13 = scmp.ne.s32.totalorder %s1194_s1, %s731_s6  ;;  %p738_p7 = scmp.lt.u32.totalorder %s731_s6, %s1194_s1 }
  0x15   : > { %p971_p11 = pnand %p644_p10, %p939_p1 }
  0x17   : > { %p733_p0 = pneg %p971_p11 }
  0x19   : > { %p734_p3 = pnand %p733_p0, %p732_p13 }
  0x1b   : > { %p735_p5 = pneg %p734_p3 }
  0x1d   : > { %p740_p10 = pnand %p738_p7, %p735_p5 }
  0x1f   : > { %743 = shalt.err (!%p740_p10)
}
  0x20   : > { %s881_s11 = smov [#allocation7]   ;;  %s744_s25 = scalar_lea.vmem %s159_s27, 16 }
  0x21   : > { %647 = dma.hbm_to_smem (!%p971_p11), %s1194_s1, 64, %s881_s11, [#allocation5]  }
  0x22   : > { %p745_p9 = scmp.ne.s32.totalorder %s159_s27, %s744_s25  ;;  %p752_p4 = scmp.lt.s32.totalorder %s159_s27, %s159_s27 }
  0x23   : > { %p753_p13 = scmp.lt.s32.totalorder %s744_s25, %s744_s25 }
  0x24   : > { %p747_p6 = pnand %p745_p9, %p733_p0 }
  0x25   : > { %p754_p3 = por %p753_p13, %p752_p4 }
  0x26   : > { %p748_p1 = pneg %p747_p6 }
  0x28   : > { %p755_p8 = pnand %p754_p3, %p748_p1 }
  0x2a   : > { %758 = shalt.err (!%p755_p8)
}
  0x2b   : > { %s882_s26 = smov [#allocation8]   ;;  %s1223_s29 = smov (%p976_p12, %s33_s29), 0 }
  0x2c   : > { %650 = dma.vmem_to_smem (!%p971_p11), %s159_s27, 16, %s882_s26, [#allocation6]  }
  0x2d   : > { %s42_s4 = sadd.s32 1, %s867_s14  ;;  %p49_p1 = scmp.ne.s32.totalorder %s867_s14, %s863_s13 }
  0x2e   : > { %s37_s5 = ssub.s32 %s875_s16, %s1223_s29  ;;  %p50_p4 = scmp.eq.s32.totalorder %s879_s17, 0 }
  0x2f   : > { %p40_p6 = scmp.eq.s32.totalorder %s37_s5, 0  ;;  %p1010_p8 = por %p943_p2, %p49_p1 }
  0x30   : > { %p51_p9 = por %p50_p4, %p49_p1  ;;  %p661_p0 = scmp.lt.s32.totalorder %s879_s17, 2 }
  0x31   : > { %s1016_s6 = scalar_select %p40_p6, %s867_s14, %s42_s4  }
  0x32   : > { %s169_s7 = sand.u32 1, %s867_s14   ;;  %s630_s27 = sshll.u32 %s875_s16, 7 }
  0x33   : > { %s583_s30 = sshll.u32 %s169_s7, 3  ;;  %s1023_s10 = scalar_lea.hbm %s1193_s0, %s630_s27 }
  0x34   : > { %s173_s21 = scalar_lea.vmem [#allocation2], %s583_s30  ;;  %p1025_p2 = pnand %p661_p0, %p51_p9 }
  0x35   : > { %s183_s11 = sshll.u32 %s173_s21, 4  ;;  %s170_s19 = scalar_lea.sflag [#allocation3], %s169_s7  ;;  %s1029_s11 = int_to_ptr.vmem [resolvable:$true] %s183_s11 }
  0x36   : > { %s759_s25 = scalar_lea.hbm %s1023_s10, 128  ;;  %p761_p12 = pneg %p1025_p2 }
  0x37   : > { %p760_p11 = scmp.ne.s32.totalorder %s1023_s10, %s759_s25  ;;  %s764_s5 = scalar_lea.hbm %s1193_s0, 256 }
  0x38   : > { %p765_p10 = scmp.lt.u32.totalorder %s1023_s10, %s1193_s0  ;;  %p766_p13 = scmp.lt.u32.totalorder %s764_s5, %s759_s25 }
  0x39   : > { %p762_p5 = pnand %p761_p12, %p760_p11  ;;  %p768_p1 = scmp.lt.u32.totalorder %s759_s25, %s1023_s10 }
  0x3a   : > { %p767_p3 = por %p766_p13, %p765_p10 }
  0x3b   : > { %p763_p7 = pneg %p762_p5 }
  0x3c   : > { %p769_p4 = por %p768_p1, %p767_p3 }
  0x3e   : > { %p770_p6 = pnand %p769_p4, %p763_p7 }
  0x40   : > { %773 = shalt.err (!%p770_p6)
}
  0x41   : > { %s774_s7 = scalar_lea.vmem %s1029_s11, 128  ;;  %s883_s8 = smov [#allocation2]  }
  0x42   : > { %p775_p9 = scmp.ne.s32.totalorder %s1029_s11, %s774_s7  ;;  %s779_s9 = sshll.u32 %s883_s8, 4  ;;  %s780_s9 = int_to_ptr.vmem [resolvable:$false] %s779_s9 }
  0x43   : > { %s781_s21 = scalar_lea.vmem %s780_s9, 256  ;;  %p782_p5 = scmp.lt.s32.totalorder %s1029_s11, %s780_s9 }
  0x44   : > { %p777_p0 = pnand %p775_p9, %p761_p12  ;;  %p783_p10 = scmp.lt.s32.totalorder %s781_s21, %s774_s7 }
  0x46   : > { %p778_p11 = pneg %p777_p0  ;;  %p784_p13 = por %p783_p10, %p782_p5 }
  0x48   : > { %p785_p3 = pnand %p784_p13, %p778_p11 }
  0x4a   : > { %788 = shalt.err (!%p785_p3)
}
  0x4b   : > { %654 = dma.hbm_to_vmem [thread:$0]  (!%p1025_p2), %s1023_s10, 128, %s1029_s11, %s170_s19  }
  0x4c   : > { %p1211_p7 = scmp.ne.s32.totalorder %s1206_s24, 0 }
  0x4d   : > { %s1059_s25 = sand.u32 (!%p1211_p7), 1, %s863_s13   ;;  %p1212_p12 = scmp.ne.s32.totalorder (!%p1211_p7), %s1204_s22, 0 }
  0x4e   : > { %192 = sbr.rel (%p1211_p7) target bundleno = 171 (0xab), region = 32  ;;  %s1201_s26 = sshll.u32 (!%p1211_p7), %s1059_s25, 3 }
  0x4f   : > { %s195_s4 = scalar_lea.sflag (!%p1211_p7), [#allocation3], %s1059_s25  ;;  %s198_s5 = scalar_lea.vmem (!%p1211_p7), [#allocation2], %s1201_s26 }
  0x55   : > { %842 = dma.done.wait (%p1212_p12), %s195_s4, 128  }
  0x56   : > { %844 = vsyncadd (%p1212_p12), %s195_s4, 4294967168  ;;  %p1213_p2 = scmp.ne.s32.totalorder %s1202_s20, 0 }
  0x58   : > { %846 = dma.done.wait (%p1213_p2), [#allocation5], 64  }
  0x59   : > { %848 = vsyncadd (%p1213_p2), [#allocation5], 4294967232 }
  0x5a   : > { %850 = dma.done.wait (%p1213_p2), [#allocation6], 16  }
  0x5b   : > { %852 = vsyncadd (%p1213_p2), [#allocation6], 4294967280 }
  0x5c   : > { %211 = sfence }
  0x5d   : > { %s233_s24 = sld [smem:[#allocation8]]  ;;  %s591_s11 = sld [smem:[#allocation7 + $0x1]]  ;;  %v1089_v0 = vld [vmem:[%s198_s5] sm:$0xff]  ;;  %vm438_vm0 = vcmask 1040384   ;;  %vm441_vm1 = vcmask 1041408   ;;  %vm444_vm2 = vcmask 1042432  }
  0x5e   : > { %s236_s10 = sld [smem:[#allocation7]]  ;;  %s593_s18 = sld [smem:[#allocation7 + $0x2]] }
  0x5f   : > { %s595_s19 = sld [smem:[#allocation7 + $0x3]]  ;;  %s1077_s22 = sld [smem:[#allocation8 + $0x1]] }
  0x60   : > { %s599_s27 = sld [smem:[#allocation7 + $0x80]]  ;;  %s600_s30 = sld [smem:[#allocation7 + $0x81]] }
  0x61   : > { %s1079_s7 = sld [smem:[#allocation7 + $0x82]]  ;;  %s1081_s8 = sld [smem:[#allocation7 + $0x83]] }
  0x62   : > { %s1083_s9 = sld [smem:[#allocation8 + $0x2]]  ;;  %s1085_s21 = sld [smem:[#allocation7 + $0x100]] }
  0x63   : > { %s1087_s20 = sld [smem:[#allocation7 + $0x101]]  ;;  %v234_v1 = vstv %s233_s24  ;;  %v241_v3 = vstv %s591_s11  ;;  %s1091_s4 = sld [smem:[#allocation7 + $0x102]] }
  0x64   : > { %v237_v2 = vstv %s236_s10  ;;  %v242_v5 = vmul.f32 %v241_v3, %v1089_v0  ;;  %v249_v6 = vstv %s593_s18  ;;  %s1095_s26 = sld [smem:[#allocation7 + $0x103]]  ;;  %s1103_s24 = sld [smem:[#allocation7 + $0x180]] }
  0x65   : > { %v238_v4 = vmul.f32 %v237_v2, %v1089_v0  ;;  %v257_v7 = vstv %s595_s19  ;;  %v250_v8 = vmul.f32 %v249_v6, %v1089_v0  ;;  %v272_v10 = vstv %s1077_s22  ;;  %s1100_s5 = sld [smem:[#allocation8 + $0x3]]  ;;  %s1105_s10 = sld [smem:[#allocation7 + $0x181]] }
  0x66   : > { %v258_v9 = vmul.f32 %v257_v7, %v1089_v0  ;;  %v275_v11 = vstv %s599_s27  ;;  %v592_v13 = vrot.slane %v242_v5, 9  ;;  %v279_v15 = vstv %s600_s30  ;;  %s1111_s11 = sld [smem:[#allocation7 + $0x182]]  ;;  %s1113_s18 = sld [smem:[#allocation7 + $0x183]] }
  0x67   : > { %v239_v12 = vadd.f32 %v238_v4, %v234_v1  ;;  %v276_v14 = vmul.f32 %v275_v11, %v1089_v0  ;;  %v594_v16 = vrot.slane %v250_v8, 10  ;;  %v280_v18 = vmul.f32 %v279_v15, %v1089_v0  ;;  %s1214_s19 = sshll.u32 %s1059_s25, 3 }
  0x68   : > { %v596_v17 = vrot.slane %v258_v9, 11  ;;  %v287_v19 = vstv %s1079_s7  ;;  %v295_v23 = vstv %s1081_s8  ;;  %v313_v26 = vstv %s1083_s9  ;;  %s229_s22 = scalar_lea.vmem [#allocation9], %s1214_s19  ;;  %s453_s9 = scalar_lea.sflag [#allocation4], %s1059_s25 }
  0x69   : > { %v247_v20 = vadd.f32 %v592_v13, %v239_v12  ;;  %v277_v21 = vadd.f32 %v276_v14, %v272_v10  ;;  %v288_v22 = vmul.f32 %v287_v19, %v1089_v0  ;;  %v601_v24 = vrot.slane %v280_v18, 9  ;;  %s469_s27 = sshll.u32 %s229_s22, 4  ;;  %s1146_s27 = int_to_ptr.vmem [resolvable:$true] %s469_s27 }
  0x6a   : > { %v296_v25 = vmul.f32 %v295_v23, %v1089_v0  ;;  %v316_v27 = vstv %s1085_s21  ;;  %v320_v31 = vstv %s1087_s20  ;;  %v328_v35 = vstv %s1091_s4  ;;  %s789_s21 = scalar_lea.vmem %s1146_s27, 128 }
  0x6b   : > { %v255_v28 = vadd.f32 %v594_v16, %v247_v20  ;;  %v603_v29 = vrot.slane %v288_v22, 10  ;;  %v317_v30 = vmul.f32 %v316_v27, %v1089_v0  ;;  %v285_v32 = vadd.f32 %v601_v24, %v277_v21  ;;  %p790_p1 = scmp.ne.s32.totalorder %s1146_s27, %s789_s21 }
  0x6c   : > { %v605_v33 = vrot.slane %v296_v25, 11  ;;  %v321_v34 = vmul.f32 %v320_v31, %v1089_v0  ;;  %v329_v38 = vmul.f32 %v328_v35, %v1089_v0  ;;  %v336_v39 = vstv %s1095_s26  ;;  %s631_s26 = sshll.u32 %s871_s15, 7  ;;  %s884_s15 = smov [#allocation9]  }
  0x6d   : > { %v263_v36 = vadd.f32 %v596_v17, %v255_v28  ;;  %v318_v37 = vadd.f32 %v317_v30, %v313_v26  ;;  %v293_v40 = vadd.f32 %v603_v29, %v285_v32  ;;  %v337_v42 = vmul.f32 %v336_v39, %v1089_v0  ;;  %s1144_s8 = scalar_lea.hbm %s1196_s3, %s631_s26  ;;  %p791_p4 = pnand %p790_p1, %p1010_p8 }
  0x6e   : > { %v610_v41 = vrot.slane %v321_v34, 9  ;;  %v354_v43 = vstv %s1100_s5  ;;  %v612_v45 = vrot.slane %v329_v38, 10  ;;  %v357_v46 = vstv %s1103_s24  ;;  %s793_s20 = sshll.u32 %s884_s15, 4  ;;  %s794_s20 = int_to_ptr.vmem [resolvable:$false] %s793_s20 }
  0x6f   : > { %v597_v44 = vmul.f32 -1.442695, %v263_v36  ;;  %v361_v47 = vstv %s1105_s10  ;;  %v301_v48 = vadd.f32 %v605_v33, %v293_v40  ;;  %v614_v50 = vrot.slane %v337_v42, 11  ;;  %p792_p6 = pneg %p791_p4  ;;  %s795_s4 = scalar_lea.vmem %s794_s20, 256 }
  0x70   : > { %v326_v49 = vadd.f32 %v610_v41, %v318_v37  ;;  %v358_v51 = vmul.f32 %v357_v46, %v1089_v0  ;;  %v362_v52 = vmul.f32 %v361_v47, %v1089_v0  ;;  %v369_v53 = vstv %s1111_s11  ;;  %p796_p9 = scmp.lt.s32.totalorder %s1146_s27, %s794_s20  ;;  %p797_p0 = scmp.lt.s32.totalorder %s795_s4, %s789_s21 }
  0x71   : > { %715 = vpow2.f32 %v597_v44  ;;  %v377_v54 = vstv %s1113_s18  ;;  %v606_v55 = vmul.f32 -1.442695, %v301_v48  ;;  %v370_v58 = vmul.f32 %v369_v53, %v1089_v0 }
  0x72   : > { %v334_v56 = vadd.f32 %v612_v45, %v326_v49  ;;  %v359_v57 = vadd.f32 %v358_v51, %v354_v43  ;;  %v619_v59 = vrot.slane %v362_v52, 9  ;;  %v378_v60 = vmul.f32 %v377_v54, %v1089_v0  ;;  %p798_p11 = por %p797_p0, %p796_p9 }
  0x73   : > { %717 = vpow2.f32 %v606_v55  ;;  %v621_v62 = vrot.slane %v370_v58, 10  ;;  %v395_v12 = vlaneseq }
  0x74   : > { %v342_v61 = vadd.f32 %v614_v50, %v334_v56  ;;  %v367_v63 = vadd.f32 %v619_v59, %v359_v57  ;;  %v623_v1 = vrot.slane %v378_v60, 11  ;;  %p799_p5 = pnand %p798_p11, %p792_p6 }
  0x75   : > { %v396_v15 = vshrl.u32 %v395_v12, 7 }
  0x76   : > { %v615_v2 = vmul.f32 -1.442695, %v342_v61  ;;  %v375_v3 = vadd.f32 %v621_v62, %v367_v63 }
  0x77   : > { %v397_v19 = vsub.s32 0, %v396_v15  ;;  %v401_v21 = vsub.s32 4, %v396_v15  ;;  %v408_v22 = vsub.s32 1, %v396_v15  ;;  %v412_v23 = vsub.s32 5, %v396_v15 }
  0x78   : > { %719 = vpow2.f32 %v615_v2  ;;  %v383_v4 = vadd.f32 %v623_v1, %v375_v3  ;;  %v419_v27 = vsub.s32 2, %v396_v15  ;;  %v423_v28 = vsub.s32 6, %v396_v15 }
  0x79   : > { %v430_v37 = vsub.s32 3, %v396_v15  ;;  %v434_v39 = vsub.s32 7, %v396_v15 }
  0x7a   : > { %v624_v6 = vmul.f32 -1.442695, %v383_v4 }
  0x7b   : > { %v716_v5 = vpop.eup %715 }
  0x7c   : > { %v267_v7 = vadd.f32 1.0, %v716_v5  ;;  %721 = vpow2.f32 %v624_v6 }
  0x7d   : > { %v718_v8 = vpop.eup %717 }
  0x7e   : > { %v305_v9 = vadd.f32 1.0, %v718_v8  ;;  %723 = vrcp.f32 %v267_v7 }
  0x80   : > { %725 = vrcp.f32 %v305_v9 }
  0x82   : > { %v720_v10 = vpop.eup %719 }
  0x83   : > { %v346_v11 = vadd.f32 1.0, %v720_v10 }
  0x85   : > { %727 = vrcp.f32 %v346_v11 }
  0x86   : > { %v722_v13 = vpop.eup %721 }
  0x87   : > { %v387_v14 = vadd.f32 1.0, %v722_v13 }
  0x88   : > { %v724_v16 = vpop.eup %723 }
  0x89   : > { %729 = vrcp.f32 %v387_v14  ;;  %v270_v20 = vmul.f32 %v724_v16, %v1089_v0 }
  0x8a   : > { %v726_v17 = vpop.eup %725 }
  0x8b   : > { %v309_v18 = vrot.slane %v726_v17, 7  ;;  %v398_v29 = vrot.slane %v270_v20, %v397_v19  ;;  %v402_v30 = vrot.slane %v270_v20, %v401_v21 }
  0x8d   : > { %v311_v24 = vmul.f32 %v309_v18, %v1089_v0 }
  0x8f   : > { %v728_v25 = vpop.eup %727  ;;  %v409_v31 = vrot.slane %v311_v24, %v408_v22  ;;  %v413_v32 = vrot.slane %v311_v24, %v412_v23 }
  0x90   : > { %v350_v26 = vrot.slane %v728_v25, 6 }
  0x91   : > { %v439_v40 = vsel %vm438_vm0, %v398_v29, %v409_v31  ;;  %v440_v41 = vsel %vm438_vm0, %v402_v30, %v413_v32 }
  0x92   : > { %v352_v33 = vmul.f32 %v350_v26, %v1089_v0 }
  0x93   : > { %v730_v34 = vpop.eup %729 }
  0x94   : > { %v420_v35 = vrot.slane %v352_v33, %v419_v27  ;;  %v424_v36 = vrot.slane %v352_v33, %v423_v28  ;;  %v391_v38 = vrot.slane %v730_v34, 5 }
  0x96   : > { %v393_v42 = vmul.f32 %v391_v38, %v1089_v0  ;;  %v442_v43 = vsel %vm441_vm1, %v439_v40, %v420_v35  ;;  %v443_v44 = vsel %vm441_vm1, %v440_v41, %v424_v36 }
  0x98   : > { %v431_v45 = vrot.slane %v393_v42, %v430_v37  ;;  %v435_v46 = vrot.slane %v393_v42, %v434_v39 }
  0x9a   : > { %v445_v47 = vsel %vm444_vm2, %v442_v43, %v431_v45  ;;  %v446_v48 = vsel %vm444_vm2, %v443_v44, %v435_v46 }
  0x9b   : > { %v449_v49 = vcombine.low %v445_v47, %v446_v48 }
  0x9d   : > { %451 = vst [vmem:[%s229_s22] sm:$0xff] %v449_v49 }
  0x9e   : > { %802 = shalt.err (!%p799_p5)
}
  0x9f   : > { %s803_s25 = scalar_lea.hbm %s1144_s8, 128  ;;  %s807_s10 = scalar_lea.hbm %s1196_s3, 256 }
  0xa0   : > { %p804_p10 = scmp.ne.s32.totalorder %s1144_s8, %s803_s25  ;;  %p808_p7 = scmp.lt.u32.totalorder %s1144_s8, %s1196_s3 }
  0xa1   : > { %p809_p12 = scmp.lt.u32.totalorder %s807_s10, %s803_s25  ;;  %p811_p1 = scmp.lt.u32.totalorder %s803_s25, %s1144_s8 }
  0xa2   : > { %p805_p13 = pnand %p804_p10, %p1010_p8 }
  0xa3   : > { %p810_p2 = por %p809_p12, %p808_p7 }
  0xa4   : > { %p806_p3 = pneg %p805_p13 }
  0xa5   : > { %p812_p4 = por %p811_p1, %p810_p2 }
  0xa7   : > { %p813_p6 = pnand %p812_p4, %p806_p3 }
  0xa9   : > { %816 = shalt.err (!%p813_p6)
}
  0xaa   : > { %642 = dma.vmem_to_hbm [thread:$0]  (%p1010_p8), %s1146_s27, 128, %s1144_s8, %s453_s9  }
  0xab PF: > { %s481_s26 = sand.u32 1, %s859_s12   ;;  %p1215_p9 = scmp.ne.s32.totalorder %s1205_s23, 0 }
  0xac   : > { %p1216_p0 = scmp.ge.s32.totalorder %s879_s17, 2  ;;  %s482_s19 = scalar_lea.sflag [#allocation4], %s481_s26 }
  0xae   : > { %p656_p11 = pnand %p1216_p0, %p1215_p9 }
  0xb0   : > { %854 = dma.done.wait (!%p656_p11), %s482_s19, 128  }
  0xb1   : > { %856 = vsyncadd (!%p656_p11), %s482_s19, 4294967168  ;;  %s21_s17 = sadd.s32 1, %s879_s17   ;;  %s1217_s12 = smov %s863_s13 }
  0xb2   : > { %p18_p5 = scmp.ge.s32.totalorder %s21_s17, 4   ;;  %s1218_s13 = smov %s867_s14 }
  0xb3   : > { %s1219_s14 = smov %s1016_s6  ;;  %s1220_s15 = smov %s875_s16 }
  0xb4   : > { %s1221_s16 = smov %s1223_s29  ;;  %20 = sbr.rel (!%p18_p5) target bundleno = 8 (0x8), region = 87 }
  0xbb   :  { %487 = vsyncpa [#allocation3], 1 }
  0xbc   :  { %489 = vsyncpa [#allocation3 + $0x1], 1 }
  0xbd   :  { %490 = vsyncpa [#allocation4], 1 }
  0xbe   :  { %492 = vsyncpa [#allocation4 + $0x1], 1 }
  0xbf   :  { %493 = vsyncpa [#allocation5], 1 }
  0xc0   :  { %495 = vsyncpa [#allocation5 + $0x1], 1 }
  0xc1   :  { %496 = vsyncpa [#allocation6], 1 }
  0xc2   :  { %498 = vsyncpa [#allocation6 + $0x1], 1 }

</bundles_post_ra>
